<compile_context>
chip_gen: v7x
topology: tpu7x:2x2x1
jax: 0.10.0
libtpu: 0.0.40
codegen_flags: <defaults>
</compile_context>

<pallas_src>
import functools

import jax
import jax.numpy as jnp
from jax import lax
from jax.experimental import pallas as pl
from jax.experimental.pallas import tpu as pltpu


_VMEM = pl.BlockSpec(memory_space=pltpu.MemorySpace.VMEM)


def _pad_up(v, m):
    return ((v + m - 1) // m) * m


def _padded_f32_bytes(shape):
    """Rough VMEM footprint of an f32 array padded to (8,128) tiles."""
    s = [int(d) for d in shape]
    if len(s) == 1:
        s = [1] + s
    lead = 1
    for d in s[:-2]:
        lead *= d
    return lead * _pad_up(s[-2], 8) * _pad_up(s[-1], 128) * 4


# ----------------------------------------------------------------------------
# Fused Pallas kernel: all ConvBlocks + both VAE heads in one invocation
# ----------------------------------------------------------------------------
def _encoder_kernel(*refs, blocks, B, eps, prec):
    """Fused ConvVAEEncoder forward.

    Ref layout (in order):
      x_ref                      : [B, Lpad0, Cin0]  zero-padded input
      per block i: w  [K*Cin, Cout]   im2col conv weight
                   gb [2, Cout]       (gamma, beta)  [or (scale, bias) if no BN]
      wh [C_last, 2D], bh [1, 2D]     fused mean/logvar head
      out_ref [B*L_final, 2D]         output
      scratch: <=2 ping-pong activation buffers [B, maxLpad, maxC] (VMEM),
               one im2col slab [max(B*L_conv), max(K*Cin)] (VMEM)
    """
    refs = list(refs)
    pos = 0
    x_ref = refs[pos]; pos += 1

    params = []
    for _ in blocks:
        params.append((refs[pos], refs[pos + 1]))
        pos += 2

    wh_ref = refs[pos]; bh_ref = refs[pos + 1]; pos += 2
    out_ref = refs[pos]; pos += 1
    scratches = refs[pos:]
    im_ref = scratches[-1]          # im2col slab
    pp = scratches[:-1]             # ping-pong activation buffers (may be empty)

    h_ref = x_ref                   # padded activation ref feeding current block
    h = None                        # flat [B*L, C] value after the last block
    for i, blk in enumerate(blocks):
        w_ref, gb_ref = params[i]
        K, Cin, Cout = blk['K'], blk['Cin'], blk['Cout']
        L_conv, L_out, pk = blk['L_conv'], blk['L_out'], blk['pk']
        rows = B * L_conv

        # ---- im2col slab build: K stripe stores into VMEM scratch -----------
        for k in range(K):
            im_ref[0:rows, k * Cin:(k + 1) * Cin] = (
                h_ref[:, k:k + L_conv, 0:Cin].reshape(rows, Cin))

        # ---- Conv1d: ONE MXU matmul per block, contraction depth K*Cin ------
        # (conv bias omitted: cancelled exactly by training-mode BatchNorm)
        acc = jnp.dot(im_ref[0:rows, 0:K * Cin], w_ref[...],
                      preferred_element_type=jnp.float32, precision=prec)

        # ---- BatchNorm1d (batch stats, biased var) folded into a*x+b --------
        if blk['norm']:
            inv_n = 1.0 / rows
            mu = jnp.sum(acc, axis=0, keepdims=True) * inv_n
            ex2 = jnp.sum(acc * acc, axis=0, keepdims=True) * inv_n
            var = jnp.maximum(ex2 - mu * mu, 0.0)
            scale = gb_ref[0:1, :] * lax.rsqrt(var + eps)   # gamma * rsqrt
            shift = gb_ref[1:2, :] - mu * scale             # beta - mu*scale
        else:
            scale = gb_ref[0:1, :]
            shift = gb_ref[1:2, :]

        # ---- fused affine + ReLU (single VPU pass) ---------------------------
        acc = jnp.maximum(acc * scale + shift, 0.0)          # [B*L_conv, Cout]

        # ---- AvgPool1d: truncating window-mean reduce (no pooling matmul) ----
        if blk['do_pool']:
            acc = acc.reshape(B, L_conv, Cout)[:, :L_out * pk, :]
            acc = jnp.mean(acc.reshape(B * L_out, pk, Cout), axis=1)
            # acc: [B*L_out, Cout]

        # ---- hand off: next block's ping-pong VMEM scratch, or the heads -----
        if i + 1 < len(blocks):
            nblk = blocks[i + 1]
            pad_n, lpad_n = nblk['pad'], nblk['Lpad']
            nxt = pp[i % len(pp)]
            if pad_n > 0:
                # zero only the halo rows; the interior is fully overwritten
                zhalo = jnp.zeros((B, pad_n, Cout), jnp.float32)
                nxt[:, 0:pad_n, 0:Cout] = zhalo
                nxt[:, pad_n + L_out:lpad_n, 0:Cout] = zhalo
            nxt[:, pad_n:pad_n + L_out, 0:Cout] = acc.reshape(B, L_out, Cout)
            h_ref = nxt
        else:
            h = acc.reshape(B * L_out, Cout)                 # [B*L_final, C_last]

    # ---- fused mean/logvar heads: one [B*L, C] @ [C, 2D] matmul --------------
    out_ref[...] = jnp.dot(h, wh_ref[...],
                           preferred_element_type=jnp.float32,
                           precision=prec) + bh_ref[...]


# ----------------------------------------------------------------------------
# Wrapper
# ----------------------------------------------------------------------------
class ConvVAEEncoderPallas:
    """Pallas port of morphelia ConvVAEEncoder (avg pooling, no conditions)."""

    def __init__(self, channel_dims, latent_dim, seq_len, kernel_size=3,
                 pooling_kernel_size=2, pool_method='avg', n_conditions=0,
                 final_pool=False, precision=lax.Precision.DEFAULT, key=None):
        assert pool_method == 'avg', "only pool_method='avg' implemented"
        assert n_conditions == 0, "conditional path not implemented"
        n = len(channel_dims)
        if isinstance(kernel_size, int):
            kernel_size = [kernel_size] * n
        if isinstance(pooling_kernel_size, int):
            pooling_kernel_size = [pooling_kernel_size] * n
        if final_pool:
            fpk = seq_len
            for pk in pooling_kernel_size[:-1]:
                fpk = fpk // pk
            pooling_kernel_size[-1] = fpk

        self.kernel_sizes = kernel_size[:n - 1]
        self.pool_ks = pooling_kernel_size[:n - 1]
        self.latent_dim = latent_dim
        self.seq_len = seq_len
        self.in_channels = channel_dims[0]
        self.precision = precision

        key = jax.random.PRNGKey(0) if key is None else key
        keys = jax.random.split(key, 2 * (n - 1) + 4)

        # Raw parameters (PyTorch default inits, kept for the reference check)
        # plus pre-fused kernel-side parameters (hoisted out of __call__).
        self.blocks = []         # (w [Cout,Cin,K], b, gamma, beta)
        self.block_params = []   # (w_mat [K*Cin, Cout], gb [2, Cout])
        block_cfg = []
        L_cur = seq_len
        for i, (cin, cout) in enumerate(zip(channel_dims[:-1], channel_dims[1:])):
            ks = self.kernel_sizes[i]
            pk = self.pool_ks[i]
            bound = 1.0 / (cin * ks) ** 0.5
            w = jax.random.uniform(keys[2 * i], (cout, cin, ks), jnp.float32,
                                   -bound, bound)
            b = jax.random.uniform(keys[2 * i + 1], (cout,), jnp.float32,
                                   -bound, bound)
            gamma = jnp.ones((cout,), jnp.float32)    # BatchNorm1d init
            beta = jnp.zeros((cout,), jnp.float32)
            self.blocks.append((w, b, gamma, beta))

            pad = (ks - 1) // 2
            lpad = L_cur + 2 * pad
            l_conv = lpad - ks + 1
            do_pool = bool(l_conv > 1)
            l_out = l_conv // pk if do_pool else l_conv
            block_cfg.append(dict(K=ks, Cin=cin, Cout=cout, pad=pad, Lpad=lpad,
                                  L_conv=l_conv, L_out=l_out, pk=pk,
                                  do_pool=do_pool, norm=True))

            # im2col weight [K*Cin, Cout]; bias dropped (BN cancels it).
            w_mat = jnp.transpose(w, (2, 1, 0)).reshape(ks * cin, cout)
            gb = jnp.stack([gamma, beta], axis=0)     # [2, Cout]
            self.block_params.append((w_mat, gb))
            L_cur = l_out

        self.block_cfg = block_cfg
        self.L_final = L_cur

        # mean / logvar Linear heads (PyTorch default Linear init bounds).
        c_last = channel_dims[-1]
        bound = 1.0 / c_last ** 0.5
        self.wm = jax.random.uniform(keys[-4], (latent_dim, c_last), jnp.float32,
                                     -bound, bound)
        self.bm = jax.random.uniform(keys[-3], (latent_dim,), jnp.float32,
                                     -bound, bound)
        self.wv = jax.random.uniform(keys[-2], (latent_dim, c_last), jnp.float32,
                                     -bound, bound)
        self.bv = jax.random.uniform(keys[-1], (latent_dim,), jnp.float32,
                                     -bound, bound)
        # Fused head weights (hoisted): [C_last, 2D], [1, 2D].
        self.wh = jnp.concatenate([self.wm.T, self.wv.T], axis=1)
        self.bh = jnp.concatenate([self.bm, self.bv]).reshape(1, 2 * latent_dim)

    def __call__(self, x):
        # x: [B, seq_len, feature]; the NLC<->NCL permutes are folded into layout.
        B, L, C = x.shape
        assert L == self.seq_len and C == self.in_channels
        D = self.latent_dim
        cfg = self.block_cfg

        # Zero-pad the block-0 input along L (glue).
        pad0 = cfg[0]['pad']
        xpad = jnp.pad(x.astype(jnp.float32), ((0, 0), (pad0, pad0), (0, 0)))

        inputs = []
        for w_mat, gb in self.block_params:
            inputs += [w_mat, gb]
        inputs += [self.wh, self.bh]

        # Scratch: <=2 ping-pong activation buffers + one im2col slab.
        n_inter = len(cfg) - 1
        scratch = []
        if n_inter > 0:
            max_lpad = max(b['Lpad'] for b in cfg[1:])
            max_c = max(b['Cin'] for b in cfg[1:])
            n_pp = min(2, n_inter)
            scratch += [pltpu.VMEM((B, max_lpad, max_c), jnp.float32)] * n_pp
        max_rows = max(B * b['L_conv'] for b in cfg)
        max_kc = max(b['K'] * b['Cin'] for b in cfg)
        scratch.append(pltpu.VMEM((max_rows, max_kc), jnp.float32))

        out_rows = B * self.L_final

        # Explicit VMEM budget (v5e scoped default 16 MiB; v7x physical 64 MiB).
        est = _padded_f32_bytes(xpad.shape) + _padded_f32_bytes((out_rows, 2 * D))
        est += sum(_padded_f32_bytes(a.shape) for a in inputs)
        if n_inter > 0:
            est += n_pp * _padded_f32_bytes((B, max_lpad, max_c))
        est += _padded_f32_bytes((max_rows, max_kc))
        vmem_limit = int(min(64 * 1024 * 1024, max(8 * 1024 * 1024, 2 * est)))

        kernel = functools.partial(_encoder_kernel, blocks=cfg, B=B, eps=1e-5,
                                   prec=self.precision)
        out = pl.pallas_call(
            kernel,
            out_shape=jax.ShapeDtypeStruct((out_rows, 2 * D), jnp.float32),
            in_specs=[_VMEM] * (1 + len(inputs)),
            out_specs=_VMEM,
            scratch_shapes=scratch,
            compiler_params=pltpu.CompilerParams(vmem_limit_bytes=vmem_limit),
        )(xpad, *inputs)

        out = out.reshape(B, self.L_final, 2 * D)
        return out[..., :D], out[..., D:]


# ----------------------------------------------------------------------------
# Pure-JAX reference (for correctness check only)
# ----------------------------------------------------------------------------
def reference_forward(x, model, eps=1e-5):
    h = jnp.transpose(x, (0, 2, 1))                                  # [B, C, L]
    for (w, b, g, beta), ks, pk in zip(model.blocks, model.kernel_sizes,
                                       model.pool_ks):
        pad = (ks - 1) // 2
        h = lax.conv_general_dilated(h, w, window_strides=(1,),
                                     padding=[(pad, pad)],
                                     dimension_numbers=('NCH', 'OIH', 'NCH'),
                                     precision=lax.Precision.HIGHEST)
        h = h + b[None, :, None]
        mu = jnp.mean(h, axis=(0, 2), keepdims=True)
        var = jnp.mean((h - mu) ** 2, axis=(0, 2), keepdims=True)
        h = (h - mu) / jnp.sqrt(var + eps) * g[None, :, None] + beta[None, :, None]
        h = jnp.maximum(h, 0.0)
        L = h.shape[-1]
        if L > 1:
            Lp = L // pk
            h = h[:, :, :Lp * pk].reshape(h.shape[0], h.shape[1], Lp, pk).mean(-1)
    h = jnp.transpose(h, (0, 2, 1))                                  # [B, L, C]
    mean = jnp.dot(h, model.wm.T, precision=lax.Precision.HIGHEST) + model.bm
    logvar = jnp.dot(h, model.wv.T, precision=lax.Precision.HIGHEST) + model.bv
    return mean, logvar


# ----------------------------------------------------------------------------
if __name__ == "__main__":
    key = jax.random.PRNGKey(0)
    channel_dims = [4, 8, 16]
    latent_dim = 8
    seq_len = 16
    batch = 2

    model = ConvVAEEncoderPallas(channel_dims, latent_dim, seq_len=seq_len,
                                 kernel_size=3, pooling_kernel_size=2, key=key)

    x = jax.random.normal(jax.random.fold_in(key, 123),
                          (batch, seq_len, channel_dims[0]), jnp.float32)

    # Production path: DEFAULT precision (bf16-native MXU passes).
    mean, log_var = model(x)
    jax.block_until_ready((mean, log_var))

    # shape check: 16 -> conv(16) -> pool(8) -> conv(8) -> pool(4)
    assert mean.shape == (batch, seq_len // 4, latent_dim), mean.shape
    assert log_var.shape == (batch, seq_len // 4, latent_dim), log_var.shape

    mean_ref, lv_ref = reference_forward(x, model)

    # Loose sanity gate for the bf16-MXU (DEFAULT precision) fast path.
    assert jnp.allclose(mean, mean_ref, atol=1e-1, rtol=1e-1), \
        float(jnp.max(jnp.abs(mean - mean_ref)))
    assert jnp.allclose(log_var, lv_ref, atol=1e-1, rtol=1e-1), \
        float(jnp.max(jnp.abs(log_var - lv_ref)))

    # Strict f32-parity gate with HIGHEST precision.
    model.precision = lax.Precision.HIGHEST
    mean_hi, lv_hi = model(x)
    jax.block_until_ready((mean_hi, lv_hi))
    assert jnp.allclose(mean_hi, mean_ref, atol=1e-4, rtol=1e-4), \
        float(jnp.max(jnp.abs(mean_hi - mean_ref)))
    assert jnp.allclose(lv_hi, lv_ref, atol=1e-4, rtol=1e-4), \
        float(jnp.max(jnp.abs(lv_hi - lv_ref)))

    print("KERNEL_OK")
</pallas_src>

<mosaic_0001>
module attributes {stable_mosaic.version = 11 : i64} {
  func.func @_encoder_kernel(%arg0: memref<2x18x4xf32, #tpu.memory_space<vmem>>, %arg1: memref<12x8xf32, #tpu.memory_space<vmem>>, %arg2: memref<2x8xf32, #tpu.memory_space<vmem>>, %arg3: memref<24x16xf32, #tpu.memory_space<vmem>>, %arg4: memref<2x16xf32, #tpu.memory_space<vmem>>, %arg5: memref<16x16xf32, #tpu.memory_space<vmem>>, %arg6: memref<1x16xf32, #tpu.memory_space<vmem>>, %arg7: memref<8x16xf32, #tpu.memory_space<vmem>>, %arg8: memref<2x10x8xf32, #tpu.memory_space<vmem>>, %arg9: memref<32x24xf32, #tpu.memory_space<vmem>>) attributes {dimension_semantics = [], scalar_prefetch = 0 : i64, scratch_operands = 2 : i64, tpu.core_type = #tpu.core_type<tc>} {
    %c0 = arith.constant 0 : index
    %c0_0 = arith.constant 0 : index
    %c0_1 = arith.constant 0 : index
    %0 = vector.load %arg0[%c0, %c0_0, %c0_1] : memref<2x18x4xf32, #tpu.memory_space<vmem>>, vector<2x16x4xf32>
    %1 = vector.shape_cast %0 : vector<2x16x4xf32> to vector<32x4xf32>
    %c0_2 = arith.constant 0 : index
    %c0_3 = arith.constant 0 : index
    %2 = vector.load %arg9[%c0_2, %c0_3] : memref<32x24xf32, #tpu.memory_space<vmem>>, vector<32x4xf32>
    tpu.vector_store %arg9[%c0_2, %c0_3], %1 {strides = array<i32>} : memref<32x24xf32, #tpu.memory_space<vmem>>, vector<32x4xf32>,
    %c0_4 = arith.constant 0 : index
    %c1 = arith.constant 1 : index
    %c0_5 = arith.constant 0 : index
    %3 = vector.load %arg0[%c0_4, %c1, %c0_5] : memref<2x18x4xf32, #tpu.memory_space<vmem>>, vector<2x16x4xf32>
    %4 = vector.shape_cast %3 : vector<2x16x4xf32> to vector<32x4xf32>
    %c0_6 = arith.constant 0 : index
    %c4 = arith.constant 4 : index
    %5 = vector.load %arg9[%c0_6, %c4] : memref<32x24xf32, #tpu.memory_space<vmem>>, vector<32x4xf32>
    tpu.vector_store %arg9[%c0_6, %c4], %4 {strides = array<i32>} : memref<32x24xf32, #tpu.memory_space<vmem>>, vector<32x4xf32>,
    %c0_7 = arith.constant 0 : index
    %c2 = arith.constant 2 : index
    %c0_8 = arith.constant 0 : index
    %6 = vector.load %arg0[%c0_7, %c2, %c0_8] : memref<2x18x4xf32, #tpu.memory_space<vmem>>, vector<2x16x4xf32>
    %7 = vector.shape_cast %6 : vector<2x16x4xf32> to vector<32x4xf32>
    %c0_9 = arith.constant 0 : index
    %c8 = arith.constant 8 : index
    %8 = vector.load %arg9[%c0_9, %c8] : memref<32x24xf32, #tpu.memory_space<vmem>>, vector<32x4xf32>
    tpu.vector_store %arg9[%c0_9, %c8], %7 {strides = array<i32>} : memref<32x24xf32, #tpu.memory_space<vmem>>, vector<32x4xf32>,
    %c0_10 = arith.constant 0 : index
    %c0_11 = arith.constant 0 : index
    %9 = vector.load %arg9[%c0_10, %c0_11] : memref<32x24xf32, #tpu.memory_space<vmem>>, vector<32x12xf32>
    %c0_12 = arith.constant 0 : index
    %c0_13 = arith.constant 0 : index
    %10 = vector.load %arg1[%c0_12, %c0_13] : memref<12x8xf32, #tpu.memory_space<vmem>>, vector<12x8xf32>
    %cst = arith.constant dense<0.000000e+00> : vector<32x8xf32>
    %11 = tpu.matmul %9, %10, %cst {dimension_numbers = #tpu.dot_dimension_numbers<[1], [0], [0], [1], [0, 0, 1, 1], [], []>} : vector<32x12xf32>, vector<12x8xf32>, vector<32x8xf32> -> vector<32x8xf32>
    %cst_14 = arith.constant dense<0.000000e+00> : vector<8xf32>
    %12 = vector.multi_reduction <add>, %11, %cst_14 [0] : vector<32x8xf32> to vector<8xf32>
    %13 = vector.shape_cast %12 : vector<8xf32> to vector<1x8xf32>
    %cst_15 = arith.constant 3.125000e-02 : f32
    %14 = vector.broadcast %cst_15 : f32 to vector<1x8xf32>
    %15 = arith.mulf %13, %14 : vector<1x8xf32>
    %16 = arith.mulf %11, %11 : vector<32x8xf32>
    %cst_16 = arith.constant dense<0.000000e+00> : vector<8xf32>
    %17 = vector.multi_reduction <add>, %16, %cst_16 [0] : vector<32x8xf32> to vector<8xf32>
    %18 = vector.shape_cast %17 : vector<8xf32> to vector<1x8xf32>
    %cst_17 = arith.constant 3.125000e-02 : f32
    %19 = vector.broadcast %cst_17 : f32 to vector<1x8xf32>
    %20 = arith.mulf %18, %19 : vector<1x8xf32>
    %21 = arith.mulf %15, %15 : vector<1x8xf32>
    %22 = arith.subf %20, %21 : vector<1x8xf32>
    %cst_18 = arith.constant 0.000000e+00 : f32
    %23 = vector.broadcast %cst_18 : f32 to vector<1x8xf32>
    %24 = arith.maximumf %22, %23 : vector<1x8xf32>
    %c0_19 = arith.constant 0 : index
    %c0_20 = arith.constant 0 : index
    %25 = vector.load %arg2[%c0_19, %c0_20] : memref<2x8xf32, #tpu.memory_space<vmem>>, vector<1x8xf32>
    %cst_21 = arith.constant 9.99999974E-6 : f32
    %26 = vector.broadcast %cst_21 : f32 to vector<1x8xf32>
    %27 = arith.addf %24, %26 : vector<1x8xf32>
    %28 = math.rsqrt %27 : vector<1x8xf32>
    %29 = arith.mulf %25, %28 : vector<1x8xf32>
    %c1_22 = arith.constant 1 : index
    %c0_23 = arith.constant 0 : index
    %30 = vector.load %arg2[%c1_22, %c0_23] : memref<2x8xf32, #tpu.memory_space<vmem>>, vector<1x8xf32>
    %31 = arith.mulf %15, %29 : vector<1x8xf32>
    %32 = arith.subf %30, %31 : vector<1x8xf32>
    %33 = vector.broadcast %29 : vector<1x8xf32> to vector<32x8xf32>
    %34 = arith.mulf %11, %33 : vector<32x8xf32>
    %35 = vector.broadcast %32 : vector<1x8xf32> to vector<32x8xf32>
    %36 = arith.addf %34, %35 : vector<32x8xf32>
    %cst_24 = arith.constant 0.000000e+00 : f32
    %37 = vector.broadcast %cst_24 : f32 to vector<32x8xf32>
    %38 = arith.maximumf %36, %37 : vector<32x8xf32>
    %39 = vector.shape_cast %38 : vector<32x8xf32> to vector<2x16x8xf32>
    %40 = vector.shape_cast %39 : vector<2x16x8xf32> to vector<16x2x8xf32>
    %cst_25 = arith.constant dense<0.000000e+00> : vector<16x8xf32>
    %41 = vector.multi_reduction <add>, %40, %cst_25 [1] : vector<16x2x8xf32> to vector<16x8xf32>
    %cst_26 = arith.constant 2.000000e+00 : f32
    %42 = vector.broadcast %cst_26 : f32 to vector<16x8xf32>
    %43 = arith.divf %41, %42 : vector<16x8xf32>
    %cst_27 = arith.constant 0.000000e+00 : f32
    %44 = vector.broadcast %cst_27 : f32 to vector<2x1x8xf32>
    %c0_28 = arith.constant 0 : index
    %c0_29 = arith.constant 0 : index
    %c0_30 = arith.constant 0 : index
    %45 = vector.load %arg8[%c0_28, %c0_29, %c0_30] : memref<2x10x8xf32, #tpu.memory_space<vmem>>, vector<2x1x8xf32>
    tpu.vector_store %arg8[%c0_28, %c0_29, %c0_30], %44 {strides = array<i32>} : memref<2x10x8xf32, #tpu.memory_space<vmem>>, vector<2x1x8xf32>,
    %c0_31 = arith.constant 0 : index
    %c9 = arith.constant 9 : index
    %c0_32 = arith.constant 0 : index
    %46 = vector.load %arg8[%c0_31, %c9, %c0_32] : memref<2x10x8xf32, #tpu.memory_space<vmem>>, vector<2x1x8xf32>
    tpu.vector_store %arg8[%c0_31, %c9, %c0_32], %44 {strides = array<i32>} : memref<2x10x8xf32, #tpu.memory_space<vmem>>, vector<2x1x8xf32>,
    %47 = vector.shape_cast %43 : vector<16x8xf32> to vector<2x8x8xf32>
    %c0_33 = arith.constant 0 : index
    %c1_34 = arith.constant 1 : index
    %c0_35 = arith.constant 0 : index
    %48 = vector.load %arg8[%c0_33, %c1_34, %c0_35] : memref<2x10x8xf32, #tpu.memory_space<vmem>>, vector<2x8x8xf32>
    tpu.vector_store %arg8[%c0_33, %c1_34, %c0_35], %47 {strides = array<i32>} : memref<2x10x8xf32, #tpu.memory_space<vmem>>, vector<2x8x8xf32>,
    %c0_36 = arith.constant 0 : index
    %c0_37 = arith.constant 0 : index
    %c0_38 = arith.constant 0 : index
    %49 = vector.load %arg8[%c0_36, %c0_37, %c0_38] : memref<2x10x8xf32, #tpu.memory_space<vmem>>, vector<2x8x8xf32>
    %50 = vector.shape_cast %49 : vector<2x8x8xf32> to vector<16x8xf32>
    %c0_39 = arith.constant 0 : index
    %c0_40 = arith.constant 0 : index
    %51 = vector.load %arg9[%c0_39, %c0_40] : memref<32x24xf32, #tpu.memory_space<vmem>>, vector<16x8xf32>
    tpu.vector_store %arg9[%c0_39, %c0_40], %50 {strides = array<i32>} : memref<32x24xf32, #tpu.memory_space<vmem>>, vector<16x8xf32>,
    %c0_41 = arith.constant 0 : index
    %c1_42 = arith.constant 1 : index
    %c0_43 = arith.constant 0 : index
    %52 = vector.load %arg8[%c0_41, %c1_42, %c0_43] : memref<2x10x8xf32, #tpu.memory_space<vmem>>, vector<2x8x8xf32>
    %53 = vector.shape_cast %52 : vector<2x8x8xf32> to vector<16x8xf32>
    %c0_44 = arith.constant 0 : index
    %c8_45 = arith.constant 8 : index
    %54 = vector.load %arg9[%c0_44, %c8_45] : memref<32x24xf32, #tpu.memory_space<vmem>>, vector<16x8xf32>
    tpu.vector_store %arg9[%c0_44, %c8_45], %53 {strides = array<i32>} : memref<32x24xf32, #tpu.memory_space<vmem>>, vector<16x8xf32>,
    %c0_46 = arith.constant 0 : index
    %c2_47 = arith.constant 2 : index
    %c0_48 = arith.constant 0 : index
    %55 = vector.load %arg8[%c0_46, %c2_47, %c0_48] : memref<2x10x8xf32, #tpu.memory_space<vmem>>, vector<2x8x8xf32>
    %56 = vector.shape_cast %55 : vector<2x8x8xf32> to vector<16x8xf32>
    %c0_49 = arith.constant 0 : index
    %c16 = arith.constant 16 : index
    %57 = vector.load %arg9[%c0_49, %c16] : memref<32x24xf32, #tpu.memory_space<vmem>>, vector<16x8xf32>
    tpu.vector_store %arg9[%c0_49, %c16], %56 {strides = array<i32>} : memref<32x24xf32, #tpu.memory_space<vmem>>, vector<16x8xf32>,
    %c0_50 = arith.constant 0 : index
    %c0_51 = arith.constant 0 : index
    %58 = vector.load %arg9[%c0_50, %c0_51] : memref<32x24xf32, #tpu.memory_space<vmem>>, vector<16x24xf32>
    %c0_52 = arith.constant 0 : index
    %c0_53 = arith.constant 0 : index
    %59 = vector.load %arg3[%c0_52, %c0_53] : memref<24x16xf32, #tpu.memory_space<vmem>>, vector<24x16xf32>
    %cst_54 = arith.constant dense<0.000000e+00> : vector<16x16xf32>
    %60 = tpu.matmul %58, %59, %cst_54 {dimension_numbers = #tpu.dot_dimension_numbers<[1], [0], [0], [1], [0, 0, 1, 1], [], []>} : vector<16x24xf32>, vector<24x16xf32>, vector<16x16xf32> -> vector<16x16xf32>
    %cst_55 = arith.constant dense<0.000000e+00> : vector<16xf32>
    %61 = vector.multi_reduction <add>, %60, %cst_55 [0] : vector<16x16xf32> to vector<16xf32>
    %62 = vector.shape_cast %61 : vector<16xf32> to vector<1x16xf32>
    %cst_56 = arith.constant 6.250000e-02 : f32
    %63 = vector.broadcast %cst_56 : f32 to vector<1x16xf32>
    %64 = arith.mulf %62, %63 : vector<1x16xf32>
    %65 = arith.mulf %60, %60 : vector<16x16xf32>
    %cst_57 = arith.constant dense<0.000000e+00> : vector<16xf32>
    %66 = vector.multi_reduction <add>, %65, %cst_57 [0] : vector<16x16xf32> to vector<16xf32>
    %67 = vector.shape_cast %66 : vector<16xf32> to vector<1x16xf32>
    %cst_58 = arith.constant 6.250000e-02 : f32
    %68 = vector.broadcast %cst_58 : f32 to vector<1x16xf32>
    %69 = arith.mulf %67, %68 : vector<1x16xf32>
    %70 = arith.mulf %64, %64 : vector<1x16xf32>
    %71 = arith.subf %69, %70 : vector<1x16xf32>
    %cst_59 = arith.constant 0.000000e+00 : f32
    %72 = vector.broadcast %cst_59 : f32 to vector<1x16xf32>
    %73 = arith.maximumf %71, %72 : vector<1x16xf32>
    %c0_60 = arith.constant 0 : index
    %c0_61 = arith.constant 0 : index
    %74 = vector.load %arg4[%c0_60, %c0_61] : memref<2x16xf32, #tpu.memory_space<vmem>>, vector<1x16xf32>
    %cst_62 = arith.constant 9.99999974E-6 : f32
    %75 = vector.broadcast %cst_62 : f32 to vector<1x16xf32>
    %76 = arith.addf %73, %75 : vector<1x16xf32>
    %77 = math.rsqrt %76 : vector<1x16xf32>
    %78 = arith.mulf %74, %77 : vector<1x16xf32>
    %c1_63 = arith.constant 1 : index
    %c0_64 = arith.constant 0 : index
    %79 = vector.load %arg4[%c1_63, %c0_64] : memref<2x16xf32, #tpu.memory_space<vmem>>, vector<1x16xf32>
    %80 = arith.mulf %64, %78 : vector<1x16xf32>
    %81 = arith.subf %79, %80 : vector<1x16xf32>
    %82 = vector.broadcast %78 : vector<1x16xf32> to vector<16x16xf32>
    %83 = arith.mulf %60, %82 : vector<16x16xf32>
    %84 = vector.broadcast %81 : vector<1x16xf32> to vector<16x16xf32>
    %85 = arith.addf %83, %84 : vector<16x16xf32>
    %cst_65 = arith.constant 0.000000e+00 : f32
    %86 = vector.broadcast %cst_65 : f32 to vector<16x16xf32>
    %87 = arith.maximumf %85, %86 : vector<16x16xf32>
    %88 = vector.shape_cast %87 : vector<16x16xf32> to vector<2x8x16xf32>
    %89 = vector.shape_cast %88 : vector<2x8x16xf32> to vector<8x2x16xf32>
    %cst_66 = arith.constant dense<0.000000e+00> : vector<8x16xf32>
    %90 = vector.multi_reduction <add>, %89, %cst_66 [1] : vector<8x2x16xf32> to vector<8x16xf32>
    %cst_67 = arith.constant 2.000000e+00 : f32
    %91 = vector.broadcast %cst_67 : f32 to vector<8x16xf32>
    %92 = arith.divf %90, %91 : vector<8x16xf32>
    %c0_68 = arith.constant 0 : index
    %c0_69 = arith.constant 0 : index
    %93 = vector.load %arg5[%c0_68, %c0_69] : memref<16x16xf32, #tpu.memory_space<vmem>>, vector<16x16xf32>
    %cst_70 = arith.constant dense<0.000000e+00> : vector<8x16xf32>
    %94 = tpu.matmul %92, %93, %cst_70 {dimension_numbers = #tpu.dot_dimension_numbers<[1], [0], [0], [1], [0, 0, 1, 1], [], []>} : vector<8x16xf32>, vector<16x16xf32>, vector<8x16xf32> -> vector<8x16xf32>
    %c0_71 = arith.constant 0 : index
    %c0_72 = arith.constant 0 : index
    %95 = vector.load %arg6[%c0_71, %c0_72] : memref<1x16xf32, #tpu.memory_space<vmem>>, vector<1x16xf32>
    %96 = vector.broadcast %95 : vector<1x16xf32> to vector<8x16xf32>
    %97 = arith.addf %94, %96 : vector<8x16xf32>
    %c0_73 = arith.constant 0 : index
    %c0_74 = arith.constant 0 : index
    %98 = vector.load %arg7[%c0_73, %c0_74] : memref<8x16xf32, #tpu.memory_space<vmem>>, vector<8x16xf32>
    tpu.vector_store %arg7[%c0_73, %c0_74], %97 {strides = array<i32>} : memref<8x16xf32, #tpu.memory_space<vmem>>, vector<8x16xf32>,
    return
  }
}

</mosaic_0001>

<bundles_post_ra>
// kernel: tpu_custom_call.1
= control target key start
LH: loop header
LB: loop body
LE: loop exit
PB: predicated region body
PF: predicated region fallthrough
CT: control target
= control target key end

     0   :  { %s1004_s28 = smov 4   ;;  %s1005_s29 = smov 8   ;;  %vm31_vm0 = vcmask 31744   ;;  %vm105_vm1 = vcmask 1043456   ;;  %vm1006_vm2 = vmmov 1   ;;  %s1276_s0 = inlined_call_operand.vmem [shape: f32[2,18,4], index: 0, kind: input, shape index: {}]   ;;  %s1277_s1 = inlined_call_operand.vmem [shape: f32[12,8], index: 1, kind: input, shape index: {}]   ;;  %s1278_s2 = inlined_call_operand.vmem [shape: f32[2,8], index: 2, kind: input, shape index: {}]   ;;  %s1279_s3 = inlined_call_operand.vmem [shape: f32[24,16], index: 3, kind: input, shape index: {}]   ;;  %s1280_s4 = inlined_call_operand.vmem [shape: f32[2,16], index: 4, kind: input, shape index: {}]   ;;  %s1281_s5 = inlined_call_operand.vmem [shape: f32[16,16], index: 5, kind: input, shape index: {}]   ;;  %s1282_s6 = inlined_call_operand.vmem [shape: f32[1,16], index: 6, kind: input, shape index: {}]   ;;  %s1283_s7 = inlined_call_operand.hbm [shape: f32[8,16], index: 7, kind: output, shape index: {}]  }
   0x1   :  { %v36_v0 = vld [vmem:[%s1276_s0 + $0x1] sm:$0xff]  ;;  %v37_v2 = vld [vmem:[%s1276_s0 + $0x9] sm:$0xff]  ;;  %v29_v6 = vld [vmem:[%s1276_s0 + $0x18] sm:$0xff] }
   0x2   :  { %v61_v1 = vld [vmem:[%s1276_s0 + $0x2] sm:$0xff]  ;;  %44 = vrot.lane.b32.xlu0 %v36_v0, %s1004_s28  ;;  %v62_v3 = vld [vmem:[%s1276_s0 + $0xa] sm:$0xff]  ;;  %34 = vst.msk [vmem:[#allocation3 + $0x10] sm:$0xff] %vm31_vm0, %v29_v6  ;;  %vm955_vm3 = vmpackc.low %vm105_vm1, %vm1006_vm2 }
   0x3   :  { %69 = vrot.lane.b32.xlu1 %v61_v1, %s1005_s29  ;;  %v27_v4 = vld [vmem:[%s1276_s0] sm:$0xff]  ;;  %v28_v5 = vld [vmem:[%s1276_s0 + $0x8] sm:$0xff] }
   0x4   :  { %32 = vst.msk [vmem:[#allocation3] sm:$0xff] %vm31_vm0, %v27_v4  ;;  %33 = vst.msk [vmem:[#allocation3 + $0x8] sm:$0xff] %vm31_vm0, %v28_v5  ;;  %v30_v7 = vld [vmem:[%s1276_s0 + $0x20] sm:$0xff]  ;;  %v91_v9 = vld [vmem:[%s1277_s1 + $0x8] sm:$0xf] }
   0x5   :  { %v90_v8 = vld [vmem:[%s1277_s1] sm:$0xff]  ;;  %35 = vst.msk [vmem:[#allocation3 + $0x18] sm:$0xff] %vm31_vm0, %v30_v7 }
   0x6   :  { %46 = vrot.lane.b32.xlu0 %v37_v2, %s1004_s28  ;;  %v954_v10 = vpack.c.bf16 %v91_v9, %v90_v8  ;;  %v38_v11 = vld [vmem:[%s1276_s0 + $0x19] sm:$0xff]  ;;  %v39_v12 = vld [vmem:[%s1276_s0 + $0x21] sm:$0xff] }
   0x7   :  { %71 = vrot.lane.b32.xlu1 %v62_v3, %s1005_s29 }
   0x8   :  { %12 = vsyncpa [#allocation5], 0  ;;  %956 = vmatprep.subr.msk.bf16.mxu0 %vm955_vm3, %v954_v10  ;;  %v63_v13 = vld [vmem:[%s1276_s0 + $0x1a] sm:$0xff]  ;;  %v64_v14 = vld [vmem:[%s1276_s0 + $0x22] sm:$0xff]  ;;  %vm56_vm4 = vcmask 64544   ;;  %vm81_vm5 = vcmask 97344   ;;  %v237_v4 = vlaneseq }
   0x9   :  { %959 = vmatpush3.bf16.msk.msra.mxu0 %vm955_vm3, %v954_v10  ;;  %vm92_vm6 = vcmask 97280   ;;  %vm475_vm7 = vcmask 57344   ;;  %v1007_v27 = vmov 0.0   ;;  %vm194_vm8 = vcmask 64512   ;;  %v230_v6 = vld [vmem:[%s1278_s2] sm:$0x1] }
   0xa   :  { %48 = vrot.lane.b32.xlu0 %v38_v11, %s1004_s28  ;;  %479 = vst.msk [vmem:[#allocation2 + $0x19] sm:$0x1] %vm475_vm7, %v1007_v27  ;;  %476 = vst.msk [vmem:[#allocation2] sm:$0x1] %vm475_vm7, %v1007_v27  ;;  %v238_v5 = vshrl.u32 %v237_v4, 7  ;;  %vm345_vm9 = vcmask 58368  }
   0xb   :  { %50 = vrot.lane.b32.xlu1 %v39_v12, %s1004_s28  ;;  %477 = vst.msk [vmem:[#allocation2 + $0x10] sm:$0x1] %vm475_vm7, %v1007_v27  ;;  %478 = vst.msk [vmem:[#allocation2 + $0x9] sm:$0x1] %vm475_vm7, %v1007_v27  ;;  %v1008_v9 = vmov 1983009808  }
   0xc   :  { %v1123_v7 = vsub.s32 0, %v238_v5  ;;  %v263_v10 = vunpack.c.l.s4 %v1008_v9  ;;  %v234_v12 = vld [vmem:[%s1278_s2 + $0x1] sm:$0x1]  ;;  %vm496_vm10 = vcmask 1041409   ;;  %vm498_vm11 = vcmask 1042434   ;;  %s1009_s16 = smov 16  }
   0xd   :  { %vm500_vm12 = vcmask 1043459   ;;  %vm502_vm13 = vcmask 1044484   ;;  %vm504_vm14 = vcmask 1045509   ;;  %vm506_vm15 = vcmask 1046534   ;;  %s1012_s23 = smov [#allocation4]  }
   0xe   :  { %73 = vrot.lane.b32.xlu0 %v63_v13, %s1005_s29  ;;  %vm508_vm0 = vcmask 1047559   ;;  %vm535_vm1 = vcmask 130112   ;;  %vm548_vm2 = vcmask 195712   ;;  %vm556_vm3 = vcmask 195584   ;;  %s897_s24 = sshll.u32 %s1012_s23, 4  ;;  %s898_s24 = int_to_ptr.vmem [resolvable:$true] %s897_s24 }
   0xf   :  { %75 = vrot.lane.b32.xlu1 %v64_v14, %s1005_s29  ;;  %s980_s25 = scalar_lea.vmem %s898_s24, 128  ;;  %p985_p1 = scmp.lt.s32.totalorder %s898_s24, %s898_s24 }
  0x10   :  { %p981_p0 = scmp.ne.s32.totalorder %s898_s24, %s980_s25  ;;  %p986_p2 = scmp.lt.s32.totalorder %s980_s25, %s980_s25 }
  0x12   :  { %p987_p3 = por %p986_p2, %p985_p1 }
  0x14   :  { %p988_p4 = pnand %p987_p3, %p981_p0 }
  0x74   :  { %v45_v15 = vpop.permute.xlu0 %44 }
  0x75   :  { %v70_v16 = vpop.permute.xlu1 %69  ;;  %57 = vst.msk [vmem:[#allocation3] sm:$0xff] %vm56_vm4, %v45_v15  ;;  %v264_v15 = vunpack.c.0.s8 %v263_v10 }
  0x76   :  { %82 = vst.msk [vmem:[#allocation3] sm:$0xff] %vm81_vm5, %v70_v16 }
  0x78   :  { %v47_v17 = vpop.permute.xlu0 %46 }
  0x79   :  { %v72_v18 = vpop.permute.xlu1 %71  ;;  %58 = vst.msk [vmem:[#allocation3 + $0x8] sm:$0xff] %vm56_vm4, %v47_v17 }
  0x7a   :  { %83 = vst.msk [vmem:[#allocation3 + $0x8] sm:$0xff] %vm81_vm5, %v72_v18 }
  0x7c   :  { %v49_v19 = vpop.permute.xlu0 %48 }
  0x7d   :  { %v51_v20 = vpop.permute.xlu1 %50  ;;  %59 = vst.msk [vmem:[#allocation3 + $0x10] sm:$0xff] %vm56_vm4, %v49_v19  ;;  %v86_v21 = vld [vmem:[#allocation3] sm:$0xff] }
  0x7e   :  { %60 = vst.msk [vmem:[#allocation3 + $0x18] sm:$0xff] %vm56_vm4, %v51_v20  ;;  %932 = vmatprep.mubr.msk.f32.mxu0 %vm92_vm6, %v86_v21  ;;  %vm1011_vm4 = vmmov 0  }
  0x80   :  { %v74_v22 = vpop.permute.xlu0 %73 }
  0x81   :  { %v76_v23 = vpop.permute.xlu1 %75  ;;  %84 = vst.msk [vmem:[#allocation3 + $0x10] sm:$0xff] %vm81_vm5, %v74_v22  ;;  %v87_v24 = vld [vmem:[#allocation3 + $0x8] sm:$0xff]  ;;  %v1130_v22 = vsub.s32 %v264_v15, %v238_v5 }
  0x82   :  { %85 = vst.msk [vmem:[#allocation3 + $0x18] sm:$0xff] %vm81_vm5, %v76_v23  ;;  %933 = vmatmul.mubr.msk.f32.vlgmr.msra.gmra.mrb[0].mxu0 %vm92_vm6, %v87_v24  ;;  %vm638_vm5 = vcmask 130048  }
  0x88   :  { %v88_v25 = vld [vmem:[#allocation3 + $0x10] sm:$0xff] }
  0x89   :  { %v89_v26 = vld [vmem:[#allocation3 + $0x18] sm:$0xff]  ;;  %935 = vmatprep.mubr.msk.f32.mxu0 %vm92_vm6, %v88_v25 }
  0x8a   :  { %936 = vmatmul.mubr.msk.f32.gmra.mrb[2].mxu0 %vm92_vm6, %v89_v26  ;;  %vm729_vm6 = vcmask 123904  }
 0x155   :  { %v934_v28 = vpop.f32.mrb[0].mxu0 }
 0x156   :  { %v196_v29 = vsel %vm194_vm8, %v934_v28, 0.0  ;;  %v210_v30 = vmul.f32 %v934_v28, %v934_v28  ;;  %v175_v31 = vpop.f32.mrb[1].mxu0 }
 0x157   :  { %v195_v32 = vsel %vm194_vm8, %v175_v31, 0.0  ;;  %v209_v33 = vmul.f32 %v175_v31, %v175_v31 }
 0x158   :  { %v214_v34 = vsel %vm194_vm8, %v210_v30, 0.0  ;;  %v197_v35 = vadd.f32 %v196_v29, %v195_v32 }
 0x159   :  { %v213_v36 = vsel %vm194_vm8, %v209_v33, 0.0 }
 0x15a   :  { %v215_v37 = vadd.f32 %v214_v34, %v213_v36 }
 0x15d   :  { %v937_v38 = vpop.f32.mrb[2].mxu0 }
 0x15e   :  { %v185_v39 = vpop.f32.mrb[3].mxu0  ;;  %v212_v40 = vmul.f32 %v937_v38, %v937_v38  ;;  %v200_v44 = vsel %vm194_vm8, %v937_v38, 0.0 }
 0x15f   :  { %v198_v41 = vsel %vm194_vm8, %v185_v39, 0.0  ;;  %v211_v42 = vmul.f32 %v185_v39, %v185_v39 }
 0x160   :  { %v199_v43 = vadd.f32 %v198_v41, %v197_v35  ;;  %v218_v48 = vsel %vm194_vm8, %v212_v40, 0.0 }
 0x161   :  { %v216_v45 = vsel %vm194_vm8, %v211_v42, 0.0 }
 0x162   :  { %v201_v46 = vadd.f32 %v200_v44, %v199_v43  ;;  %v217_v47 = vadd.f32 %v216_v45, %v215_v37 }
 0x164   :  { %v202_v49 = vrot.slane %v201_v46, 4  ;;  %v219_v50 = vadd.f32 %v218_v48, %v217_v47 }
 0x166   :  { %v203_v51 = vadd.f32 %v202_v49, %v201_v46  ;;  %v220_v52 = vrot.slane %v219_v50, 4 }
 0x168   :  { %v204_v53 = vrot.slane %v203_v51, 2  ;;  %v221_v54 = vadd.f32 %v220_v52, %v219_v50 }
 0x16a   :  { %v205_v55 = vadd.f32 %v204_v53, %v203_v51  ;;  %v222_v56 = vrot.slane %v221_v54, 2 }
 0x16c   :  { %v206_v57 = vrot.slane %v205_v55, 1  ;;  %v223_v58 = vadd.f32 %v222_v56, %v221_v54 }
 0x16e   :  { %v207_v59 = vadd.f32 %v206_v57, %v205_v55  ;;  %v224_v60 = vrot.slane %v223_v58, 1 }
 0x170   :  { %v208_v61 = vmul.f32 0.03125, %v207_v59  ;;  %v225_v62 = vadd.f32 %v224_v60, %v223_v58 }
 0x172   :  { %v226_v63 = vmul.f32 0.03125, %v225_v62  ;;  %v227_v0 = vmul.f32 %v208_v61, %v208_v61 }
 0x174   :  { %v228_v1 = vsub.f32 %v226_v63, %v227_v0 }
 0x176   :  { %v229_v2 = vmax.f32 %v228_v1, 0.0 }
 0x178   :  { %v231_v3 = vadd.f32 1e-05, %v229_v2 }
 0x17a   :  { %976 = vrsqrt.f32 %v231_v3 }
 0x184   :  { %v977_v8 = vpop.eup %976 }
 0x185   :  { %v233_v11 = vmul.f32 %v977_v8, %v230_v6 }
 0x187   :  { %v235_v13 = vmul.f32 %v233_v11, %v208_v61  ;;  %v240_v14 = vrot.slane %v233_v11, %v1123_v7 }
 0x189   :  { %v236_v16 = vsub.f32 %v234_v12, %v235_v13  ;;  %v241_v17 = vmul.f32 %v240_v14, %v175_v31  ;;  %v242_v18 = vmul.f32 %v934_v28, %v240_v14  ;;  %v243_v19 = vmul.f32 %v240_v14, %v185_v39 }
 0x18a   :  { %v244_v20 = vmul.f32 %v937_v38, %v240_v14 }
 0x18b   :  { %v248_v21 = vrot.slane %v236_v16, %v1123_v7 }
 0x18d   :  { %v249_v23 = vadd.f32 %v248_v21, %v241_v17  ;;  %v250_v24 = vadd.f32 %v248_v21, %v242_v18  ;;  %v251_v25 = vadd.f32 %v248_v21, %v243_v19  ;;  %v252_v26 = vadd.f32 %v248_v21, %v244_v20 }
 0x18f   :  { %v253_v29 = vmax.f32 %v249_v23, 0.0  ;;  %v254_v30 = vmax.f32 %v250_v24, 0.0  ;;  %v255_v32 = vmax.f32 %v251_v25, 0.0  ;;  %v256_v33 = vmax.f32 %v252_v26, 0.0 }
 0x191   :  { %v261_v34 = vcombine.high %v253_v29, %v253_v29  ;;  %v268_v35 = vrot.slane %v253_v29, %v1130_v22  ;;  %v278_v36 = vcombine.high %v254_v30, %v254_v30  ;;  %v285_v28 = vrot.slane %v254_v30, %v1130_v22 }
 0x192   :  { %v295_v31 = vcombine.high %v255_v32, %v255_v32  ;;  %v302_v37 = vrot.slane %v255_v32, %v1130_v22  ;;  %v312_v38 = vcombine.high %v256_v33, %v256_v33  ;;  %v1141_v44 = vrot.slane %v256_v33, %v1130_v22 }
 0x193   :  { %v275_v39 = vrot.slane %v261_v34, %v1130_v22  ;;  %v276_v40 = vcombine.high %v268_v35, %v268_v35  ;;  %v292_v41 = vrot.slane %v278_v36, %v1130_v22  ;;  %v293_v42 = vcombine.high %v285_v28, %v285_v28 }
 0x194   :  { %v1138_v43 = vrot.slane %v295_v31, %v1130_v22  ;;  %v346_v47 = vsel %vm345_vm9, %v268_v35, 0.0  ;;  %v310_v49 = vcombine.high %v302_v37, %v302_v37  ;;  %v1146_v50 = vrot.slane %v312_v38, %v1130_v22 }
 0x195   :  { %v277_v45 = vcombine.high %v275_v39, %v275_v39  ;;  %v294_v46 = vcombine.high %v292_v41, %v292_v41  ;;  %v353_v48 = vsel %vm345_vm9, %v276_v40, 0.0  ;;  %v347_v51 = vrot.slane %v346_v47, 4 }
 0x196   :  { %v354_v52 = vrot.slane %v353_v48, 4  ;;  %v360_v53 = vsel %vm345_vm9, %v275_v39, 0.0  ;;  %v374_v55 = vsel %vm345_vm9, %v285_v28, 0.0  ;;  %v381_v56 = vsel %vm345_vm9, %v293_v42, 0.0 }
 0x197   :  { %v367_v54 = vsel %vm345_vm9, %v277_v45, 0.0  ;;  %v348_v57 = vadd.f32 %v347_v51, %v346_v47  ;;  %v361_v59 = vrot.slane %v360_v53, 4  ;;  %v375_v61 = vrot.slane %v374_v55, 4 }
 0x198   :  { %v355_v58 = vadd.f32 %v354_v52, %v353_v48  ;;  %v368_v60 = vrot.slane %v367_v54, 4  ;;  %v382_v62 = vrot.slane %v381_v56, 4  ;;  %v388_v63 = vsel %vm345_vm9, %v292_v41, 0.0 }
 0x199   :  { %v395_v0 = vsel %vm345_vm9, %v294_v46, 0.0  ;;  %v349_v1 = vrot.slane %v348_v57, 2  ;;  %v362_v3 = vadd.f32 %v361_v59, %v360_v53  ;;  %v376_v5 = vadd.f32 %v375_v61, %v374_v55 }
 0x19a   :  { %v356_v2 = vrot.slane %v355_v58, 2  ;;  %v369_v4 = vadd.f32 %v368_v60, %v367_v54  ;;  %v383_v6 = vadd.f32 %v382_v62, %v381_v56  ;;  %v389_v8 = vrot.slane %v388_v63, 4 }
 0x19b   :  { %v396_v9 = vrot.slane %v395_v0, 4  ;;  %v350_v10 = vadd.f32 %v349_v1, %v348_v57  ;;  %v363_v12 = vrot.slane %v362_v3, 2  ;;  %v377_v14 = vrot.slane %v376_v5, 2 }
 0x19c   :  { %v357_v11 = vadd.f32 %v356_v2, %v355_v58  ;;  %v370_v13 = vrot.slane %v369_v4, 2  ;;  %v384_v15 = vrot.slane %v383_v6, 2  ;;  %v390_v16 = vadd.f32 %v389_v8, %v388_v63 }
 0x19d   :  { %v397_v17 = vadd.f32 %v396_v9, %v395_v0  ;;  %v351_v18 = vrot.slane %v350_v10, 1  ;;  %v364_v20 = vadd.f32 %v363_v12, %v362_v3  ;;  %v378_v23 = vadd.f32 %v377_v14, %v376_v5 }
 0x19e   :  { %v358_v19 = vrot.slane %v357_v11, 1  ;;  %v371_v21 = vadd.f32 %v370_v13, %v369_v4  ;;  %v1154_v24 = vadd.f32 %v384_v15, %v383_v6  ;;  %v391_v25 = vrot.slane %v390_v16, 2 }
 0x19f   :  { %v398_v26 = vrot.slane %v397_v17, 2  ;;  %v311_v29 = vcombine.high %v1138_v43, %v1138_v43  ;;  %v327_v30 = vcombine.high %v1141_v44, %v1141_v44  ;;  %v328_v32 = vcombine.high %v1146_v50, %v1146_v50 }
 0x1a0   :  { %v365_v33 = vrot.slane %v364_v20, 1  ;;  %v372_v34 = vrot.slane %v371_v21, 1  ;;  %v1162_v35 = vadd.f32 %v351_v18, %v350_v10  ;;  %v1164_v36 = vadd.f32 %v358_v19, %v357_v11 }
 0x1a1   :  { %v402_v28 = vsel %vm345_vm9, %v302_v37, 0.0  ;;  %v409_v31 = vsel %vm345_vm9, %v310_v49, 0.0  ;;  %v379_v38 = vrot.slane %v378_v23, 1  ;;  %v386_v39 = vrot.slane %v1154_v24, 1 }
 0x1a2   :  { %v1169_v40 = vadd.f32 %v391_v25, %v390_v16  ;;  %v1171_v41 = vadd.f32 %v398_v26, %v397_v17  ;;  %v403_v42 = vrot.slane %v402_v28, 4  ;;  %v410_v45 = vrot.slane %v409_v31, 4 }
 0x1a3   :  { %v416_v46 = vsel %vm345_vm9, %v1138_v43, 0.0  ;;  %v423_v47 = vsel %vm345_vm9, %v311_v29, 0.0  ;;  %v366_v48 = vadd.f32 %v365_v33, %v364_v20  ;;  %v1176_v51 = vadd.f32 %v372_v34, %v371_v21 }
 0x1a4   :  { %v417_v37 = vrot.slane %v416_v46, 4  ;;  %v424_v52 = vrot.slane %v423_v47, 4  ;;  %v404_v49 = vadd.f32 %v403_v42, %v402_v28  ;;  %v411_v53 = vadd.f32 %v410_v45, %v409_v31 }
 0x1a5   :  { %v430_v54 = vsel %vm345_vm9, %v1141_v44, 0.0  ;;  %v437_v55 = vsel %vm345_vm9, %v327_v30, 0.0  ;;  %v444_v61 = vsel %vm345_vm9, %v1146_v50, 0.0  ;;  %v451_v62 = vsel %vm345_vm9, %v328_v32, 0.0 }
 0x1a6   :  { %v418_v56 = vadd.f32 %v417_v37, %v416_v46  ;;  %v425_v57 = vadd.f32 %v424_v52, %v423_v47  ;;  %v431_v58 = vrot.slane %v430_v54, 4  ;;  %v438_v59 = vrot.slane %v437_v55, 4 }
 0x1a7   :  { %v405_v60 = vrot.slane %v404_v49, 2  ;;  %v412_v43 = vrot.slane %v411_v53, 2  ;;  %v445_v44 = vrot.slane %v444_v61, 4  ;;  %v452_v5 = vrot.slane %v451_v62, 4 }
 0x1a8   :  { %v419_v63 = vrot.slane %v418_v56, 2  ;;  %v426_v0 = vrot.slane %v425_v57, 2  ;;  %v432_v1 = vadd.f32 %v431_v58, %v430_v54  ;;  %v439_v2 = vadd.f32 %v438_v59, %v437_v55 }
 0x1a9   :  { %v406_v3 = vadd.f32 %v405_v60, %v404_v49  ;;  %v413_v4 = vadd.f32 %v412_v43, %v411_v53  ;;  %v446_v13 = vadd.f32 %v445_v44, %v444_v61  ;;  %v453_v50 = vadd.f32 %v452_v5, %v451_v62 }
 0x1aa   :  { %v420_v6 = vadd.f32 %v419_v63, %v418_v56  ;;  %v427_v8 = vadd.f32 %v426_v0, %v425_v57  ;;  %v433_v9 = vrot.slane %v432_v1, 2  ;;  %v440_v10 = vrot.slane %v439_v2, 2 }
 0x1ab   :  { %v407_v11 = vrot.slane %v406_v3, 1  ;;  %v414_v12 = vrot.slane %v413_v4, 1  ;;  %v380_v18 = vadd.f32 %v379_v38, %v378_v23  ;;  %v393_v19 = vrot.slane %v1169_v40, 1 }
 0x1ac   :  { %v421_v14 = vrot.slane %v420_v6, 1  ;;  %v428_v15 = vrot.slane %v427_v8, 1  ;;  %v434_v16 = vadd.f32 %v433_v9, %v432_v1  ;;  %v441_v17 = vadd.f32 %v440_v10, %v439_v2  ;;  %v553_v10 = vld [vmem:[%s1279_s3] sm:$0xff] }
 0x1ad   :  { %v447_v20 = vrot.slane %v446_v13, 2  ;;  %v454_v21 = vrot.slane %v453_v50, 2  ;;  %v408_v25 = vadd.f32 %v407_v11, %v406_v3  ;;  %v415_v26 = vadd.f32 %v414_v12, %v413_v4  ;;  %v554_v11 = vld [vmem:[%s1279_s3 + $0x8] sm:$0xff] }
 0x1ae   :  { %v435_v29 = vrot.slane %v434_v16, 1  ;;  %v442_v30 = vrot.slane %v441_v17, 1  ;;  %v422_v32 = vadd.f32 %v421_v14, %v420_v6  ;;  %v429_v33 = vadd.f32 %v428_v15, %v427_v8 }
 0x1af   :  { %v448_v34 = vadd.f32 %v447_v20, %v446_v13  ;;  %v455_v28 = vadd.f32 %v454_v21, %v453_v50  ;;  %v387_v31 = vadd.f32 %v386_v39, %v1154_v24  ;;  %v400_v42 = vrot.slane %v1171_v41, 1  ;;  %v555_v13 = vld [vmem:[%s1279_s3 + $0x10] sm:$0xff] }
 0x1b0   :  { %v459_v23 = vmul.f32 0.5, %v1162_v35  ;;  %v460_v38 = vmul.f32 0.5, %v1164_v36  ;;  %v436_v45 = vadd.f32 %v435_v29, %v434_v16  ;;  %v461_v37 = vmul.f32 0.5, %v366_v48 }
 0x1b1   :  { %v449_v46 = vrot.slane %v448_v34, 1  ;;  %v456_v47 = vrot.slane %v455_v28, 1  ;;  %v443_v52 = vadd.f32 %v442_v30, %v441_v17  ;;  %v462_v49 = vmul.f32 0.5, %v1176_v51  ;;  %v794_v30 = vld [vmem:[%s1281_s5] sm:$0xff] }
 0x1b2   :  { %v467_v53 = vmul.f32 0.5, %v408_v25  ;;  %v468_v54 = vmul.f32 0.5, %v415_v26  ;;  %v394_v55 = vadd.f32 %v393_v19, %v1169_v40  ;;  %v469_v57 = vmul.f32 0.5, %v422_v32  ;;  %v795_v32 = vld [vmem:[%s1281_s5 + $0x8] sm:$0xff] }
 0x1b3   :  { %v450_v56 = vadd.f32 %v449_v46, %v448_v34  ;;  %v470_v24 = vmul.f32 0.5, %v429_v33  ;;  %v401_v39 = vadd.f32 %v400_v42, %v1171_v41  ;;  %v457_v58 = vadd.f32 %v456_v47, %v455_v28 }
 0x1b4   :  { %v497_v35 = vsel %vm496_vm10, %v460_v38, %v459_v23  ;;  %v510_v36 = vsel %vm496_vm10, %v468_v54, %v467_v53  ;;  %v463_v59 = vmul.f32 0.5, %v380_v18  ;;  %v471_v60 = vmul.f32 0.5, %v436_v45 }
 0x1b5   :  { %v499_v48 = vsel %vm498_vm11, %v461_v37, %v497_v35  ;;  %v511_v51 = vsel %vm498_vm11, %v469_v57, %v510_v36  ;;  %v464_v43 = vmul.f32 0.5, %v387_v31  ;;  %v472_v61 = vmul.f32 0.5, %v443_v52 }
 0x1b6   :  { %v501_v40 = vsel %vm500_vm12, %v462_v49, %v499_v48  ;;  %v512_v62 = vsel %vm500_vm12, %v470_v24, %v511_v51  ;;  %v465_v63 = vmul.f32 0.5, %v394_v55  ;;  %v473_v0 = vmul.f32 0.5, %v450_v56 }
 0x1b7   :  { %v503_v41 = vsel %vm502_vm13, %v463_v59, %v501_v40  ;;  %v513_v1 = vsel %vm502_vm13, %v471_v60, %v512_v62  ;;  %v466_v2 = vmul.f32 0.5, %v401_v39  ;;  %v474_v3 = vmul.f32 0.5, %v457_v58  ;;  %v664_v40 = vld [vmem:[%s1280_s4] sm:$0x1] }
 0x1b8   :  { %v505_v4 = vsel %vm504_vm14, %v464_v43, %v503_v41  ;;  %v514_v44 = vsel %vm504_vm14, %v472_v61, %v513_v1  ;;  %v960_v12 = vpack.c.bf16 %v554_v11, %v553_v10  ;;  %v1010_v33 = vmov 0.0|0.0  }
 0x1b9   :  { %v507_v5 = vsel %vm506_vm15, %v465_v63, %v505_v4  ;;  %v515_v6 = vsel %vm506_vm15, %v473_v0, %v514_v44  ;;  %v965_v34 = vpack.c.bf16 %v795_v32, %v794_v30  ;;  %v668_v0 = vld [vmem:[%s1280_s4 + $0x1] sm:$0x1] }
 0x1ba   :  { %v516_v8 = vsel %vm508_vm0, %v474_v3, %v515_v6  ;;  %v509_v9 = vsel %vm508_vm0, %v466_v2, %v507_v5  ;;  %961 = vmatprep.subr.bf16.mxu1 %v960_v12 }
 0x1bb   :  { %520 = vst.msk [vmem:[#allocation2 + $0x11] sm:$0xff] %vm194_vm8, %v516_v8  ;;  %519 = vst.msk [vmem:[#allocation2 + $0x1] sm:$0xff] %vm194_vm8, %v509_v9  ;;  %963 = vmatpush3.bf16.msra.mxu1 %v960_v12 }
 0x1bc   :  { %942 = vmatprep.subr.mxu1 %v555_v13 }
 0x1bf   :  { %943 = vmatpush3.msra.mxu1 %v555_v13 }
 0x1c0   :  { %964 = vmatprep.subr.bf16.mxu1 %v1010_v33 }
 0x1c2   :  { %v526_v50 = vld [vmem:[#allocation2 + $0x11] sm:$0xff]  ;;  %v525_v14 = vld [vmem:[#allocation2 + $0x1] sm:$0xff] }
 0x1c3   :  { %531 = vrot.lane.b32.xlu1 %v526_v50, %s1005_s29  ;;  %529 = vrot.lane.b32.xlu0 %v525_v14, %s1005_s29  ;;  %v522_v15 = vld [vmem:[#allocation2 + $0x10] sm:$0xff]  ;;  %v521_v16 = vld [vmem:[#allocation2] sm:$0xff] }
 0x1c4   :  { %524 = vst.msk [vmem:[#allocation3 + $0x8] sm:$0xff] %vm194_vm8, %v522_v15  ;;  %523 = vst.msk [vmem:[#allocation3] sm:$0xff] %vm194_vm8, %v521_v16  ;;  %v539_v17 = vld [vmem:[#allocation2 + $0x12] sm:$0xff]  ;;  %v538_v18 = vld [vmem:[#allocation2 + $0x2] sm:$0xff] }
 0x1c7   :  { %544 = vrot.lane.b32.xlu1 %v539_v17, %s1009_s16  ;;  %542 = vrot.lane.b32.xlu0 %v538_v18, %s1009_s16 }
 0x235   :  { %v532_v19 = vpop.permute.xlu1 %531  ;;  %v530_v20 = vpop.permute.xlu0 %529 }
 0x236   :  { %537 = vst.msk [vmem:[#allocation3 + $0x8] sm:$0xff] %vm535_vm1, %v532_v19  ;;  %536 = vst.msk [vmem:[#allocation3] sm:$0xff] %vm535_vm1, %v530_v20 }
 0x239   :  { %v545_v21 = vpop.permute.xlu1 %544  ;;  %v543_v25 = vpop.permute.xlu0 %542 }
 0x23a   :  { %550 = vst.msk [vmem:[#allocation3 + $0x8] sm:$0xff] %vm548_vm2, %v545_v21  ;;  %549 = vst.msk [vmem:[#allocation3] sm:$0xff] %vm548_vm2, %v543_v25 }
 0x241   :  { %v551_v26 = vld [vmem:[#allocation3] sm:$0xff]  ;;  %v552_v29 = vld [vmem:[#allocation3 + $0x8] sm:$0xff] }
 0x242   :  { %944 = vmatprep.mubr.msk.f32.mxu1 %vm556_vm3, %v551_v26 }
 0x243   :  { %945 = vmatmul.mubr.msk.f32.vlgmr.msra.gmra.mrb[0].mxu1 %vm556_vm3, %v552_v29 }
 0x244   :  { %951 = vmatprep.mubr.msk.f32.mxu1 %vm1011_vm4, %v1007_v27  ;;  %966 = vmatpush3.bf16.msra.mxu1 %v965_v34 }
 0x316   :  { %v946_v28 = vpop.f32.mrb[0].mxu1 }
 0x317   :  { %v640_v31 = vsel %vm638_vm5, %v946_v28, 0.0  ;;  %v650_v42 = vmul.f32 %v946_v28, %v946_v28  ;;  %v629_v23 = vpop.f32.mrb[1].mxu1 }
 0x318   :  { %v639_v38 = vsel %vm638_vm5, %v629_v23, 0.0  ;;  %v649_v45 = vmul.f32 %v629_v23, %v629_v23 }
 0x319   :  { %v652_v46 = vsel %vm638_vm5, %v650_v42, 0.0  ;;  %v641_v47 = vadd.f32 %v640_v31, %v639_v38 }
 0x31a   :  { %v651_v37 = vsel %vm638_vm5, %v649_v45, 0.0 }
 0x31b   :  { %v642_v52 = vrot.slane %v641_v47, 4  ;;  %v653_v49 = vadd.f32 %v652_v46, %v651_v37 }
 0x31d   :  { %v643_v53 = vadd.f32 %v642_v52, %v641_v47  ;;  %v654_v54 = vrot.slane %v653_v49, 4 }
 0x31f   :  { %v644_v27 = vrot.slane %v643_v53, 2  ;;  %v655_v55 = vadd.f32 %v654_v54, %v653_v49 }
 0x321   :  { %v645_v56 = vadd.f32 %v644_v27, %v643_v53  ;;  %v656_v57 = vrot.slane %v655_v55, 2 }
 0x323   :  { %v646_v24 = vrot.slane %v645_v56, 1  ;;  %v657_v39 = vadd.f32 %v656_v57, %v655_v55 }
 0x325   :  { %v647_v58 = vadd.f32 %v646_v24, %v645_v56  ;;  %v658_v35 = vrot.slane %v657_v39, 1 }
 0x327   :  { %v648_v36 = vmul.f32 0.0625, %v647_v58  ;;  %v659_v59 = vadd.f32 %v658_v35, %v657_v39 }
 0x329   :  { %v660_v60 = vmul.f32 0.0625, %v659_v59  ;;  %v661_v48 = vmul.f32 %v648_v36, %v648_v36 }
 0x32b   :  { %v662_v51 = vsub.f32 %v660_v60, %v661_v48 }
 0x32d   :  { %v663_v43 = vmax.f32 %v662_v51, 0.0 }
 0x32f   :  { %v665_v61 = vadd.f32 1e-05, %v663_v43 }
 0x331   :  { %978 = vrsqrt.f32 %v665_v61 }
 0x33b   :  { %v979_v62 = vpop.eup %978 }
 0x33c   :  { %v667_v63 = vmul.f32 %v979_v62, %v664_v40 }
 0x33e   :  { %v669_v41 = vmul.f32 %v667_v63, %v648_v36  ;;  %v674_v1 = vrot.slane %v667_v63, %v1123_v7 }
 0x340   :  { %v670_v2 = vsub.f32 %v668_v0, %v669_v41  ;;  %v675_v3 = vmul.f32 %v674_v1, %v629_v23  ;;  %v676_v4 = vmul.f32 %v946_v28, %v674_v1 }
 0x342   :  { %v680_v44 = vrot.slane %v670_v2, %v1123_v7 }
 0x344   :  { %v681_v5 = vadd.f32 %v680_v44, %v675_v3  ;;  %v682_v6 = vadd.f32 %v680_v44, %v676_v4 }
 0x346   :  { %v683_v8 = vmax.f32 %v681_v5, 0.0  ;;  %v684_v9 = vmax.f32 %v682_v6, 0.0 }
 0x348   :  { %v687_v10 = vcombine.high %v683_v8, %v683_v8  ;;  %v694_v11 = vrot.slane %v683_v8, %v1130_v22  ;;  %v704_v12 = vcombine.high %v684_v9, %v684_v9  ;;  %v711_v13 = vrot.slane %v684_v9, %v1130_v22 }
 0x34a   :  { %v701_v50 = vrot.slane %v687_v10, %v1130_v22  ;;  %v702_v14 = vcombine.high %v694_v11, %v694_v11  ;;  %v718_v15 = vrot.slane %v704_v12, %v1130_v22  ;;  %v719_v16 = vcombine.high %v711_v13, %v711_v13 }
 0x34b   :  { %v730_v17 = vsel %vm729_vm6, %v694_v11, 0.0  ;;  %v758_v7 = vsel %vm729_vm6, %v711_v13, 0.0 }
 0x34c   :  { %v703_v18 = vcombine.high %v701_v50, %v701_v50  ;;  %v720_v19 = vcombine.high %v718_v15, %v718_v15  ;;  %v731_v20 = vrot.slane %v730_v17, 4  ;;  %v737_v21 = vsel %vm729_vm6, %v702_v14, 0.0 }
 0x34d   :  { %v738_v25 = vrot.slane %v737_v21, 4  ;;  %v744_v26 = vsel %vm729_vm6, %v701_v50, 0.0  ;;  %v759_v29 = vrot.slane %v758_v7, 4  ;;  %v765_v30 = vsel %vm729_vm6, %v719_v16, 0.0 }
 0x34e   :  { %v732_v32 = vadd.f32 %v731_v20, %v730_v17  ;;  %v745_v33 = vrot.slane %v744_v26, 4  ;;  %v751_v22 = vsel %vm729_vm6, %v703_v18, 0.0  ;;  %v766_v34 = vrot.slane %v765_v30, 4 }
 0x34f   :  { %v739_v28 = vadd.f32 %v738_v25, %v737_v21  ;;  %v752_v31 = vrot.slane %v751_v22, 4  ;;  %v760_v42 = vadd.f32 %v759_v29, %v758_v7  ;;  %v772_v23 = vsel %vm729_vm6, %v718_v15, 0.0 }
 0x350   :  { %v733_v38 = vrot.slane %v732_v32, 2  ;;  %v746_v45 = vadd.f32 %v745_v33, %v744_v26  ;;  %v767_v46 = vadd.f32 %v766_v34, %v765_v30  ;;  %v773_v47 = vrot.slane %v772_v23, 4  ;;  %v912_v30 = vld [vmem:[%s1282_s6] ss:$0 sm:$0xff] }
 0x351   :  { %v740_v37 = vrot.slane %v739_v28, 2  ;;  %v753_v52 = vadd.f32 %v752_v31, %v751_v22  ;;  %v761_v49 = vrot.slane %v760_v42, 2  ;;  %v779_v53 = vsel %vm729_vm6, %v720_v19, 0.0 }
 0x352   :  { %v734_v54 = vadd.f32 %v733_v38, %v732_v32  ;;  %v747_v27 = vrot.slane %v746_v45, 2  ;;  %v768_v55 = vrot.slane %v767_v46, 2  ;;  %v774_v56 = vadd.f32 %v773_v47, %v772_v23 }
 0x353   :  { %v741_v57 = vadd.f32 %v740_v37, %v739_v28  ;;  %v754_v24 = vrot.slane %v753_v52, 2  ;;  %v762_v39 = vadd.f32 %v761_v49, %v760_v42  ;;  %v780_v58 = vrot.slane %v779_v53, 4 }
 0x354   :  { %v735_v35 = vrot.slane %v734_v54, 1  ;;  %v748_v36 = vadd.f32 %v747_v27, %v746_v45  ;;  %v769_v59 = vadd.f32 %v768_v55, %v767_v46  ;;  %v775_v60 = vrot.slane %v774_v56, 2 }
 0x355   :  { %v742_v48 = vrot.slane %v741_v57, 1  ;;  %v755_v51 = vadd.f32 %v754_v24, %v753_v52  ;;  %v763_v43 = vrot.slane %v762_v39, 1  ;;  %v781_v61 = vadd.f32 %v780_v58, %v779_v53 }
 0x356   :  { %v736_v40 = vadd.f32 %v735_v35, %v734_v54  ;;  %v749_v62 = vrot.slane %v748_v36, 1  ;;  %v770_v63 = vrot.slane %v769_v59, 1  ;;  %v776_v0 = vadd.f32 %v775_v60, %v774_v56 }
 0x357   :  { %v743_v41 = vadd.f32 %v742_v48, %v741_v57  ;;  %v756_v1 = vrot.slane %v755_v51, 1  ;;  %v782_v2 = vrot.slane %v781_v61, 2  ;;  %v764_v44 = vadd.f32 %v763_v43, %v762_v39 }
 0x358   :  { %v750_v3 = vadd.f32 %v749_v62, %v748_v36  ;;  %v786_v4 = vmul.f32 0.5, %v736_v40  ;;  %v777_v5 = vrot.slane %v776_v0, 1  ;;  %v771_v9 = vadd.f32 %v770_v63, %v769_v59 }
 0x359   :  { %v757_v6 = vadd.f32 %v756_v1, %v755_v51  ;;  %v787_v8 = vmul.f32 0.5, %v743_v41  ;;  %v783_v10 = vadd.f32 %v782_v2, %v781_v61  ;;  %v790_v15 = vmul.f32 0.5, %v764_v44 }
 0x35a   :  { %v788_v11 = vmul.f32 0.5, %v750_v3  ;;  %v778_v12 = vadd.f32 %v777_v5, %v776_v0  ;;  %v791_v7 = vmul.f32 0.5, %v771_v9 }
 0x35b   :  { %v784_v13 = vrot.slane %v783_v10, 1  ;;  %v789_v50 = vmul.f32 0.5, %v757_v6  ;;  %v811_v14 = vsel %vm496_vm10, %v787_v8, %v786_v4 }
 0x35c   :  { %v812_v16 = vsel %vm498_vm11, %v788_v11, %v811_v14  ;;  %v792_v19 = vmul.f32 0.5, %v778_v12 }
 0x35d   :  { %v785_v17 = vadd.f32 %v784_v13, %v783_v10  ;;  %v813_v18 = vsel %vm500_vm12, %v789_v50, %v812_v16 }
 0x35e   :  { %v814_v20 = vsel %vm502_vm13, %v790_v15, %v813_v18 }
 0x35f   :  { %v793_v21 = vmul.f32 0.5, %v785_v17  ;;  %v815_v25 = vsel %vm504_vm14, %v791_v7, %v814_v20 }
 0x360   :  { %v816_v26 = vsel %vm506_vm15, %v792_v19, %v815_v25 }
 0x361   :  { %v817_v29 = vsel %vm508_vm0, %v793_v21, %v816_v26 }
 0x362   :  { %952 = vmatmul.mubr.msk.f32.vlgmr.msra.gmra.mrb[2].mxu1 %vm638_vm5, %v817_v29 }
 0x435   :  { %v886_v32 = vpop.f32.mrb[2].mxu1 }
 0x436   :  { %v887_v33 = vadd.f32 %v912_v30, %v886_v32  ;;  %v953_v22 = vpop.f32.mrb[3].mxu1 }
 0x438   :  { %890 = vst.msk [vmem:[#allocation4] sm:$0xff] %vm638_vm5, %v887_v33 }
 0x439   :  { %991 = shalt.err (!%p988_p4)
}
 0x43a   :  { %s992_s27 = scalar_lea.hbm %s1283_s7, 128 }
 0x43b   :  { %p993_p5 = scmp.ne.s32.totalorder %s1283_s7, %s992_s27  ;;  %p996_p6 = scmp.lt.u32.totalorder %s992_s27, %s1283_s7 }
 0x43d   :  { %p998_p7 = pnand %p996_p6, %p993_p5 }
 0x43f   :  { %1001 = shalt.err (!%p998_p7)
}
 0x440   :  { %900 = dma.vmem_to_hbm [thread:$0]  %s898_s24, 128, %s1283_s7, [#allocation5]  }
 0x441   :  { %1002 = dma.done.wait [#allocation5], 128  }
 0x442   :  { %1003 = vsyncadd [#allocation5], 4294967168 }
 0x443   :  { %904 = vsyncpa [#allocation5], 1 }

</bundles_post_ra>
